<compile_context>
chip_gen: v7x
topology: tpu7x:2x2x1
jax: 0.10.0
libtpu: 0.0.40
codegen_flags: <defaults>
</compile_context>

<pallas_src>
import functools

import jax
import jax.numpy as jnp
from jax import lax
from jax.experimental import pallas as pl
from jax.experimental.pallas import tpu as pltpu

_LANE = 128
_MAX_BLOCK_ROWS = 4096      # (4096, 128) f32 = 2 MiB per input stream per buffer


def _dice_sums_kernel(x_ref, t_ref, m_ref,
                      inter_ref, sums_ref,
                      acc_i, acc_s,
                      *, use_sigmoid: bool, block_rows: int,
                      blocks_per_shard: int, valid_rows: int,
                      has_ragged: bool):
    c = pl.program_id(0)          # parallel shard axis (megacore split on v7x)
    i = pl.program_id(1)          # sequential reduction axis

    @pl.when(i == 0)
    def _():
        acc_i[...] = jnp.zeros_like(acc_i)
        acc_s[...] = jnp.zeros_like(acc_s)

    # Native-dtype loads; cast to f32 in-register (no wrapper HBM pass).
    x = x_ref[...].astype(jnp.float32)
    if use_sigmoid:
        # Single EUP push + one cheap VPU fma (instead of exp + full divide).
        x = 0.5 * (jnp.tanh(0.5 * x) + 1.0)
    t = t_ref[...].astype(jnp.float32)
    m = m_ref[...]                # native mask dtype; no widening cast

    def accumulate(keep):
        # jnp.where (not multiply) so OOB / padded garbage (possibly NaN) is
        # truly excluded.  Sublane-only reductions into lane-vector accs.
        xk = jnp.where(keep, x, 0.0)
        tk = jnp.where(keep, t, 0.0)
        acc_i[...] += jnp.sum(xk * tk, axis=0, keepdims=True)
        acc_s[...] += jnp.sum(xk + tk, axis=0, keepdims=True)

    if has_ragged:
        # Logical (UNCLAMPED) block index: duplicated tail steps from the odd
        # block-count megacore split land at row0 >= valid_rows -> fully masked.
        row0 = (c * blocks_per_shard + i) * block_rows
        is_full = row0 + block_rows <= valid_rows

        @pl.when(is_full)
        def _():                              # fast path: interior blocks
            accumulate(m == 0)

        @pl.when(jnp.logical_not(is_full))
        def _():                              # ragged tail / duplicated block
            row_ids = row0 + lax.broadcasted_iota(jnp.int32, x.shape, 0)
            accumulate((m == 0) & (row_ids < valid_rows))
    else:
        accumulate(m == 0)

    @pl.when(i == pl.num_programs(1) - 1)
    def _():
        inter_ref[0] = acc_i[...]
        sums_ref[0] = acc_s[...]


def dice_loss_mask(x, target, mask, smooth: float = 1.0,
                   use_sigmoid: bool = True):
    """Pallas implementation of DiceLoss_mask.forward.

    x, target: float arrays (any shape, e.g. NCHW), any float dtype
    mask:      bool/int array, nonzero (True) means "exclude this element"
    """
    xf = x.reshape(-1)                       # free for contiguous inputs
    tf = target.reshape(-1)
    mf = mask.reshape(-1)
    if not jnp.issubdtype(mf.dtype, jnp.integer):
        # bool / float masks -> narrow 1-byte stream; int masks stream natively.
        mf = (mf != 0).astype(jnp.int8)

    n = xf.shape[0]
    pad = (-n) % _LANE
    if pad:
        # Only when n is not a multiple of 128 lanes; padded elems excluded
        # via mask=1 (exclude).
        xf = jnp.pad(xf, (0, pad))
        tf = jnp.pad(tf, (0, pad))
        mf = jnp.pad(mf, (0, pad), constant_values=1)

    rows = (n + pad) // _LANE
    x2 = xf.reshape(rows, _LANE)
    t2 = tf.reshape(rows, _LANE)
    m2 = mf.reshape(rows, _LANE)

    # Big streaming blocks; a single full-array block for small inputs
    # (block == full dims is always layout-legal).
    block_rows = rows if rows <= _MAX_BLOCK_ROWS else _MAX_BLOCK_ROWS
    num_blocks = pl.cdiv(rows, block_rows)
    num_shards = 2 if num_blocks >= 2 else 1     # always 2 when possible (v7x)
    blocks_per_shard = pl.cdiv(num_blocks, num_shards)
    has_ragged = num_shards * blocks_per_shard * block_rows > rows
    grid = (num_shards, blocks_per_shard)
    last_block = num_blocks - 1

    kernel = functools.partial(
        _dice_sums_kernel,
        use_sigmoid=use_sigmoid,
        block_rows=block_rows,
        blocks_per_shard=blocks_per_shard,
        valid_rows=rows,
        has_ragged=has_ragged,
    )

    def in_map(c, i):
        # Clamp so duplicated tail steps (odd block split) read valid HBM;
        # their contribution is zeroed in-kernel via the unclamped row index.
        return (jnp.minimum(c * blocks_per_shard + i, last_block), 0)

    def out_map(c, i):
        return (c, 0, 0)

    elems = rows * _LANE
    bytes_accessed = (x2.size * x2.dtype.itemsize
                      + t2.size * t2.dtype.itemsize
                      + m2.size * m2.dtype.itemsize
                      + num_shards * 2 * _LANE * 4)
    cost = pl.CostEstimate(
        flops=8 * elems,
        transcendentals=elems if use_sigmoid else 0,
        bytes_accessed=bytes_accessed,
    )

    inter_p, sums_p = pl.pallas_call(
        kernel,
        out_shape=(
            jax.ShapeDtypeStruct((num_shards, 1, _LANE), jnp.float32),
            jax.ShapeDtypeStruct((num_shards, 1, _LANE), jnp.float32),
        ),
        grid_spec=pltpu.PrefetchScalarGridSpec(
            num_scalar_prefetch=0,
            grid=grid,
            in_specs=[
                pl.BlockSpec((block_rows, _LANE), in_map),
                pl.BlockSpec((block_rows, _LANE), in_map),
                pl.BlockSpec((block_rows, _LANE), in_map),
            ],
            out_specs=[
                pl.BlockSpec((1, 1, _LANE), out_map),
                pl.BlockSpec((1, 1, _LANE), out_map),
            ],
            scratch_shapes=[
                pltpu.VMEM((1, _LANE), jnp.float32),
                pltpu.VMEM((1, _LANE), jnp.float32),
            ],
        ),
        compiler_params=pltpu.CompilerParams(
            dimension_semantics=("parallel", "arbitrary"),
            vmem_limit_bytes=32 << 20,   # one code path across v5e/v6e/v7x
        ),
        cost_estimate=cost,
    )(x2, t2, m2)

    # Tiny epilogue: cross-lane / cross-shard reduction + dice arithmetic.
    intersection = jnp.sum(inter_p)
    sum_in_plus_tg = jnp.sum(sums_p)
    dice = (2.0 * intersection + smooth) / (sum_in_plus_tg + smooth)
    return 1.0 - dice


def _reference(x, target, mask, smooth=1.0, use_sigmoid=True):
    """Plain-JAX reference mirroring the PyTorch forward."""
    xf = x.reshape(-1).astype(jnp.float32)
    tf = target.reshape(-1).astype(jnp.float32)
    keep = (mask.reshape(-1) == 0).astype(jnp.float32)
    if use_sigmoid:
        xf = jax.nn.sigmoid(xf)
    xf = xf * keep
    tf = tf * keep
    inter = jnp.sum(xf * tf)
    dice = (2.0 * inter + smooth) / (jnp.sum(xf) + jnp.sum(tf) + smooth)
    return 1.0 - dice


if __name__ == "__main__":
    key = jax.random.PRNGKey(0)
    k1, k2, k3 = jax.random.split(key, 3)

    B, C, H, W = 2, 4, 16, 16          # NCHW, as in PyTorch
    x = jax.random.normal(k1, (B, C, H, W), dtype=jnp.float32)
    target = (jax.random.uniform(k2, (B, C, H, W)) > 0.5).astype(jnp.float32)
    mask = (jax.random.uniform(k3, (B, C, H, W)) > 0.7).astype(jnp.int32)

    loss = dice_loss_mask(x, target, mask, smooth=1.0, use_sigmoid=True)
    loss = jax.block_until_ready(loss)

    ref = _reference(x, target, mask, smooth=1.0, use_sigmoid=True)
    assert jnp.allclose(loss, ref, rtol=1e-5, atol=1e-5), (loss, ref)

    print("KERNEL_OK")
</pallas_src>

<mosaic_0001>
module attributes {stable_mosaic.version = 11 : i64} {
  func.func @_dice_sums_kernel(%arg0: i32, %arg1: i32, %arg2: memref<16x128xf32, #tpu.memory_space<vmem>>, %arg3: memref<16x128xf32, #tpu.memory_space<vmem>>, %arg4: memref<16x128xi32, #tpu.memory_space<vmem>>, %arg5: memref<1x1x128xf32, #tpu.memory_space<vmem>>, %arg6: memref<1x1x128xf32, #tpu.memory_space<vmem>>, %arg7: memref<1x128xf32, #tpu.memory_space<vmem>>, %arg8: memref<1x128xf32, #tpu.memory_space<vmem>>) attributes {dimension_semantics = [#tpu.dimension_semantics<parallel>, #tpu.dimension_semantics<arbitrary>], iteration_bounds = array<i64: 1, 1>, scalar_prefetch = 0 : i64, scratch_operands = 2 : i64, tpu.core_type = #tpu.core_type<tc>, window_params = [{transform_indices = @transform_0, window_bounds = array<i64: 16, 128>}, {transform_indices = @transform_1, window_bounds = array<i64: 16, 128>}, {transform_indices = @transform_2, window_bounds = array<i64: 16, 128>}, {transform_indices = @transform_3, window_bounds = array<i64: 1, 1, 128>}, {transform_indices = @transform_4, window_bounds = array<i64: 1, 1, 128>}]} {
    %c0_i32 = arith.constant 0 : i32
    %0 = arith.cmpi eq, %arg1, %c0_i32 : i32
    %1 = arith.extui %0 : i1 to i32
    %c0_i32_0 = arith.constant 0 : i32
    %2 = arith.cmpi ne, %1, %c0_i32_0 : i32
    scf.if %2 {
      %cst_23 = arith.constant 0.000000e+00 : f32
      %34 = vector.broadcast %cst_23 : f32 to vector<1x128xf32>
      %c0_24 = arith.constant 0 : index
      %c0_25 = arith.constant 0 : index
      %35 = vector.load %arg7[%c0_24, %c0_25] : memref<1x128xf32, #tpu.memory_space<vmem>>, vector<1x128xf32>
      tpu.vector_store %arg7[%c0_24, %c0_25], %34 {strides = array<i32>} : memref<1x128xf32, #tpu.memory_space<vmem>>, vector<1x128xf32>,
      %cst_26 = arith.constant 0.000000e+00 : f32
      %36 = vector.broadcast %cst_26 : f32 to vector<1x128xf32>
      %c0_27 = arith.constant 0 : index
      %c0_28 = arith.constant 0 : index
      %37 = vector.load %arg8[%c0_27, %c0_28] : memref<1x128xf32, #tpu.memory_space<vmem>>, vector<1x128xf32>
      tpu.vector_store %arg8[%c0_27, %c0_28], %36 {strides = array<i32>} : memref<1x128xf32, #tpu.memory_space<vmem>>, vector<1x128xf32>,
    } else {
    }
    %c0 = arith.constant 0 : index
    %c0_1 = arith.constant 0 : index
    %3 = vector.load %arg2[%c0, %c0_1] : memref<16x128xf32, #tpu.memory_space<vmem>>, vector<16x128xf32>
    %cst = arith.constant 5.000000e-01 : f32
    %4 = vector.broadcast %cst : f32 to vector<16x128xf32>
    %5 = arith.mulf %4, %3 : vector<16x128xf32>
    %6 = math.tanh %5 : vector<16x128xf32>
    %cst_2 = arith.constant 1.000000e+00 : f32
    %7 = vector.broadcast %cst_2 : f32 to vector<16x128xf32>
    %8 = arith.addf %6, %7 : vector<16x128xf32>
    %cst_3 = arith.constant 5.000000e-01 : f32
    %9 = vector.broadcast %cst_3 : f32 to vector<16x128xf32>
    %10 = arith.mulf %9, %8 : vector<16x128xf32>
    %c0_4 = arith.constant 0 : index
    %c0_5 = arith.constant 0 : index
    %11 = vector.load %arg3[%c0_4, %c0_5] : memref<16x128xf32, #tpu.memory_space<vmem>>, vector<16x128xf32>
    %c0_6 = arith.constant 0 : index
    %c0_7 = arith.constant 0 : index
    %12 = vector.load %arg4[%c0_6, %c0_7] : memref<16x128xi32, #tpu.memory_space<vmem>>, vector<16x128xi32>
    %c0_i32_8 = arith.constant 0 : i32
    %13 = vector.broadcast %c0_i32_8 : i32 to vector<16x128xi32>
    %14 = arith.cmpi eq, %12, %13 : vector<16x128xi32>
    %cst_9 = arith.constant 0.000000e+00 : f32
    %15 = vector.broadcast %cst_9 : f32 to vector<16x128xf32>
    %16 = arith.select %14, %10, %15 : vector<16x128xi1>, vector<16x128xf32>
    %cst_10 = arith.constant 0.000000e+00 : f32
    %17 = vector.broadcast %cst_10 : f32 to vector<16x128xf32>
    %18 = arith.select %14, %11, %17 : vector<16x128xi1>, vector<16x128xf32>
    %c0_11 = arith.constant 0 : index
    %c0_12 = arith.constant 0 : index
    %19 = vector.load %arg7[%c0_11, %c0_12] : memref<1x128xf32, #tpu.memory_space<vmem>>, vector<1x128xf32>
    %20 = arith.mulf %16, %18 : vector<16x128xf32>
    %cst_13 = arith.constant dense<0.000000e+00> : vector<128xf32>
    %21 = vector.multi_reduction <add>, %20, %cst_13 [0] : vector<16x128xf32> to vector<128xf32>
    %22 = vector.shape_cast %21 : vector<128xf32> to vector<1x128xf32>
    %23 = arith.addf %19, %22 : vector<1x128xf32>
    %c0_14 = arith.constant 0 : index
    %c0_15 = arith.constant 0 : index
    %24 = vector.load %arg7[%c0_14, %c0_15] : memref<1x128xf32, #tpu.memory_space<vmem>>, vector<1x128xf32>
    tpu.vector_store %arg7[%c0_14, %c0_15], %23 {strides = array<i32>} : memref<1x128xf32, #tpu.memory_space<vmem>>, vector<1x128xf32>,
    %c0_16 = arith.constant 0 : index
    %c0_17 = arith.constant 0 : index
    %25 = vector.load %arg8[%c0_16, %c0_17] : memref<1x128xf32, #tpu.memory_space<vmem>>, vector<1x128xf32>
    %26 = arith.addf %16, %18 : vector<16x128xf32>
    %cst_18 = arith.constant dense<0.000000e+00> : vector<128xf32>
    %27 = vector.multi_reduction <add>, %26, %cst_18 [0] : vector<16x128xf32> to vector<128xf32>
    %28 = vector.shape_cast %27 : vector<128xf32> to vector<1x128xf32>
    %29 = arith.addf %25, %28 : vector<1x128xf32>
    %c0_19 = arith.constant 0 : index
    %c0_20 = arith.constant 0 : index
    %30 = vector.load %arg8[%c0_19, %c0_20] : memref<1x128xf32, #tpu.memory_space<vmem>>, vector<1x128xf32>
    tpu.vector_store %arg8[%c0_19, %c0_20], %29 {strides = array<i32>} : memref<1x128xf32, #tpu.memory_space<vmem>>, vector<1x128xf32>,
    %c0_i32_21 = arith.constant 0 : i32
    %31 = arith.cmpi eq, %arg1, %c0_i32_21 : i32
    %32 = arith.extui %31 : i1 to i32
    %c0_i32_22 = arith.constant 0 : i32
    %33 = arith.cmpi ne, %32, %c0_i32_22 : i32
    scf.if %33 {
      %c0_23 = arith.constant 0 : index
      %c0_24 = arith.constant 0 : index
      %34 = vector.load %arg7[%c0_23, %c0_24] : memref<1x128xf32, #tpu.memory_space<vmem>>, vector<1x128xf32>
      %c0_25 = arith.constant 0 : index
      %c0_26 = arith.constant 0 : index
      %c0_27 = arith.constant 0 : index
      %35 = vector.load %arg5[%c0_25, %c0_26, %c0_27] : memref<1x1x128xf32, #tpu.memory_space<vmem>>, vector<1x1x128xf32>
      %36 = vector.shape_cast %35 : vector<1x1x128xf32> to vector<1x128xf32>
      %37 = vector.shape_cast %34 : vector<1x128xf32> to vector<1x1x128xf32>
      tpu.vector_store %arg5[%c0_25, %c0_26, %c0_27], %37 {strides = array<i32>} : memref<1x1x128xf32, #tpu.memory_space<vmem>>, vector<1x1x128xf32>,
      %c0_28 = arith.constant 0 : index
      %c0_29 = arith.constant 0 : index
      %38 = vector.load %arg8[%c0_28, %c0_29] : memref<1x128xf32, #tpu.memory_space<vmem>>, vector<1x128xf32>
      %c0_30 = arith.constant 0 : index
      %c0_31 = arith.constant 0 : index
      %c0_32 = arith.constant 0 : index
      %39 = vector.load %arg6[%c0_30, %c0_31, %c0_32] : memref<1x1x128xf32, #tpu.memory_space<vmem>>, vector<1x1x128xf32>
      %40 = vector.shape_cast %39 : vector<1x1x128xf32> to vector<1x128xf32>
      %41 = vector.shape_cast %38 : vector<1x128xf32> to vector<1x1x128xf32>
      tpu.vector_store %arg6[%c0_30, %c0_31, %c0_32], %41 {strides = array<i32>} : memref<1x1x128xf32, #tpu.memory_space<vmem>>, vector<1x1x128xf32>,
    } else {
    }
    return
  }
  func.func @transform_0(%arg0: i32, %arg1: i32) -> (i32, i32) {
    %c1_i32 = arith.constant 1 : i32
    %0 = arith.muli %arg0, %c1_i32 : i32
    %1 = arith.addi %0, %arg1 : i32
    %c0_i32 = arith.constant 0 : i32
    %2 = arith.minsi %1, %c0_i32 : i32
    %c0_i32_0 = arith.constant 0 : i32
    %c0_i32_1 = arith.constant 0 : i32
    return %2, %c0_i32_0 : i32, i32
  }
  func.func @transform_1(%arg0: i32, %arg1: i32) -> (i32, i32) {
    %c1_i32 = arith.constant 1 : i32
    %0 = arith.muli %arg0, %c1_i32 : i32
    %1 = arith.addi %0, %arg1 : i32
    %c0_i32 = arith.constant 0 : i32
    %2 = arith.minsi %1, %c0_i32 : i32
    %c0_i32_0 = arith.constant 0 : i32
    %c0_i32_1 = arith.constant 0 : i32
    return %2, %c0_i32_0 : i32, i32
  }
  func.func @transform_2(%arg0: i32, %arg1: i32) -> (i32, i32) {
    %c1_i32 = arith.constant 1 : i32
    %0 = arith.muli %arg0, %c1_i32 : i32
    %1 = arith.addi %0, %arg1 : i32
    %c0_i32 = arith.constant 0 : i32
    %2 = arith.minsi %1, %c0_i32 : i32
    %c0_i32_0 = arith.constant 0 : i32
    %c0_i32_1 = arith.constant 0 : i32
    return %2, %c0_i32_0 : i32, i32
  }
  func.func @transform_3(%arg0: i32, %arg1: i32) -> (i32, i32, i32) {
    %c0_i32 = arith.constant 0 : i32
    %c0_i32_0 = arith.constant 0 : i32
    %c0_i32_1 = arith.constant 0 : i32
    return %arg0, %c0_i32, %c0_i32_0 : i32, i32, i32
  }
  func.func @transform_4(%arg0: i32, %arg1: i32) -> (i32, i32, i32) {
    %c0_i32 = arith.constant 0 : i32
    %c0_i32_0 = arith.constant 0 : i32
    %c0_i32_1 = arith.constant 0 : i32
    return %arg0, %c0_i32, %c0_i32_0 : i32, i32, i32
  }
}

</mosaic_0001>

<bundles_post_ra>
// kernel: tpu_custom_call.1
= control target key start
LH: loop header
LB: loop body
LE: loop exit
PB: predicated region body
PF: predicated region fallthrough
CT: control target
= control target key end

     0   :  { %10 = vsyncpa [#allocation5], 0  ;;  %s429_s0 = inlined_call_operand.hbm [shape: f32[16,128], index: 0, kind: input, shape index: {}]   ;;  %s430_s1 = inlined_call_operand.hbm [shape: f32[16,128], index: 1, kind: input, shape index: {}]   ;;  %s431_s2 = inlined_call_operand.hbm [shape: s32[16,128], index: 2, kind: input, shape index: {}]   ;;  %s432_s3 = inlined_call_operand.hbm [shape: f32[1,1,128], index: 3, kind: output, shape index: {0}]   ;;  %s433_s4 = inlined_call_operand.hbm [shape: f32[1,1,128], index: 4, kind: output, shape index: {1}]  }
   0x1   :  { %11 = vsyncpa [#allocation8], 0 }
   0x2   :  { %12 = vsyncpa [#allocation6], 0 }
   0x3   :  { %13 = vsyncpa [#allocation12], 0  ;;  %s312_s15 = smov [#allocation7]   ;;  %s313_s17 = smov [#allocation4]  }
   0x4   :  { %s43_s16 = sshll.u32 %s312_s15, 4  ;;  %s25_s18 = sshll.u32 %s313_s17, 4  ;;  %s44_s16 = int_to_ptr.vmem [resolvable:$true] %s43_s16  ;;  %s345_s18 = int_to_ptr.vmem [resolvable:$true] %s25_s18 }
   0x5   :  { %s194_s21 = scalar_lea.hbm %s430_s1, 256 }
   0x6   :  { %p195_p0 = scmp.ne.s32.totalorder %s430_s1, %s194_s21  ;;  %p198_p1 = scmp.lt.u32.totalorder %s194_s21, %s430_s1 }
   0x8   :  { %p200_p2 = pnand %p198_p1, %p195_p0 }
   0xa   :  { %203 = shalt.err (!%p200_p2)
}
   0xb   :  { %s204_s26 = scalar_lea.vmem %s44_s16, 256  ;;  %p209_p4 = scmp.lt.s32.totalorder %s44_s16, %s44_s16 }
   0xc   :  { %p205_p3 = scmp.ne.s32.totalorder %s44_s16, %s204_s26  ;;  %p210_p5 = scmp.lt.s32.totalorder %s204_s26, %s204_s26 }
   0xe   :  { %p211_p6 = por %p210_p5, %p209_p4 }
  0x10   :  { %p212_p7 = pnand %p211_p6, %p205_p3 }
  0x12   :  { %215 = shalt.err (!%p212_p7)
}
  0x13   :  { %s314_s27 = smov 128   ;;  %s315_s28 = smov 8  }
  0x14   :  { %49 = dma.hbm_to_vmem [thread:$0]  %s430_s1, 256, %s44_s16, [#allocation8], %s314_s27, %s314_s27, %s315_s28  }
  0x15   :  { %s216_s7 = scalar_lea.hbm %s429_s0, 256 }
  0x16   :  { %p217_p8 = scmp.ne.s32.totalorder %s429_s0, %s216_s7  ;;  %p220_p9 = scmp.lt.u32.totalorder %s216_s7, %s429_s0 }
  0x18   :  { %p222_p10 = pnand %p220_p9, %p217_p8 }
  0x1a   :  { %225 = shalt.err (!%p222_p10)
}
  0x1b   :  { %s226_s12 = scalar_lea.vmem %s345_s18, 256  ;;  %p231_p12 = scmp.lt.s32.totalorder %s345_s18, %s345_s18 }
  0x1c   :  { %p227_p11 = scmp.ne.s32.totalorder %s345_s18, %s226_s12  ;;  %p232_p13 = scmp.lt.s32.totalorder %s226_s12, %s226_s12 }
  0x1e   :  { %p233_p0 = por %p232_p13, %p231_p12 }
  0x20   :  { %p234_p1 = pnand %p233_p0, %p227_p11 }
  0x22   :  { %237 = shalt.err (!%p234_p1)
}
  0x23   :  { %31 = dma.hbm_to_vmem [thread:$0]  %s429_s0, 256, %s345_s18, [#allocation5], %s314_s27, %s314_s27, %s315_s28  }
  0x24   :  { %s316_s14 = smov [#allocation9]   ;;  %s238_s19 = scalar_lea.hbm %s431_s2, 256 }
  0x25   :  { %s61_s15 = sshll.u32 %s316_s14, 4  ;;  %p239_p2 = scmp.ne.s32.totalorder %s431_s2, %s238_s19  ;;  %s62_s15 = int_to_ptr.vmem [resolvable:$true] %s61_s15 }
  0x26   :  { %p242_p3 = scmp.lt.u32.totalorder %s238_s19, %s431_s2 }
  0x28   :  { %p244_p4 = pnand %p242_p3, %p239_p2 }
  0x2a   :  { %247 = shalt.err (!%p244_p4)
}
  0x2b   :  { %s248_s24 = scalar_lea.vmem %s62_s15, 256  ;;  %p253_p6 = scmp.lt.s32.totalorder %s62_s15, %s62_s15 }
  0x2c   :  { %p249_p5 = scmp.ne.s32.totalorder %s62_s15, %s248_s24  ;;  %p254_p7 = scmp.lt.s32.totalorder %s248_s24, %s248_s24 }
  0x2e   :  { %p255_p8 = por %p254_p7, %p253_p6 }
  0x30   :  { %p256_p9 = pnand %p255_p8, %p249_p5 }
  0x32   :  { %259 = shalt.err (!%p256_p9)
}
  0x33   :  { %67 = dma.hbm_to_vmem [thread:$0]  %s431_s2, 256, %s62_s15, [#allocation8], %s314_s27, %s314_s27, %s315_s28  }
  0x34   :  { %304 = dma.done.wait [#allocation5], 256  }
  0x35   :  { %305 = vsyncadd [#allocation5], 4294967040 }
  0x36   :  { %306 = dma.done.wait [#allocation8], 512  }
  0x37   :  { %307 = vsyncadd [#allocation8], 4294966784  ;;  %v317_v0 = vmov 0.0   ;;  %v95_v1 = vld [vmem:[#allocation4] sm:$0xff]  ;;  %v96_v2 = vld [vmem:[#allocation4 + $0x8] sm:$0xff]  ;;  %s318_s2 = smov [#allocation10]  }
  0x38   :  { %93 = vst [vmem:[#allocation2] sm:$0x1] %v317_v0  ;;  %94 = vst [vmem:[#allocation3] sm:$0x1] %v317_v0  ;;  %v97_v3 = vmul.f32 0.5, %v95_v1  ;;  %v98_v4 = vmul.f32 0.5, %v96_v2 }
  0x39   :  { %v107_v5 = vld [vmem:[#allocation9] sm:$0xff]  ;;  %v108_v6 = vld [vmem:[#allocation9 + $0x8] sm:$0xff]  ;;  %v105_v8 = vld [vmem:[#allocation7] sm:$0xff]  ;;  %s152_s25 = sshll.u32 %s318_s2, 4  ;;  %s319_s26 = smov [#allocation11]   ;;  %s153_s25 = int_to_ptr.vmem [resolvable:$true] %s152_s25 }
  0x3a   :  { %190 = vtanh.f32 %v97_v3  ;;  %vm109_vm0 = vcmp.eq.s32.totalorder %v107_v5, 0  ;;  %v106_v11 = vld [vmem:[#allocation7 + $0x8] sm:$0xff]  ;;  %vm110_vm1 = vcmp.eq.s32.totalorder %v108_v6, 0  ;;  %s162_s27 = sshll.u32 %s319_s26, 4  ;;  %s260_s28 = scalar_lea.vmem %s153_s25, 16  ;;  %s397_s27 = int_to_ptr.vmem [resolvable:$true] %s162_s27 }
  0x3b   :  { %192 = vtanh.f32 %v98_v4  ;;  %v113_v14 = vsel %vm109_vm0, %v105_v8, 0.0  ;;  %v114_v16 = vsel %vm110_vm1, %v106_v11, 0.0  ;;  %p261_p10 = scmp.ne.s32.totalorder %s153_s25, %s260_s28  ;;  %s264_s29 = scalar_lea.vmem %s153_s25, 32 }
  0x3c   :  { %p265_p11 = scmp.lt.s32.totalorder %s153_s25, %s153_s25  ;;  %p266_p12 = scmp.lt.s32.totalorder %s264_s29, %s260_s28 }
  0x3e   :  { %p267_p13 = por %p266_p12, %p265_p11 }
  0x3f   :  { %v115_v35 = vld [vmem:[#allocation2] sm:$0x1]  ;;  %v127_v36 = vld [vmem:[#allocation3] sm:$0x1] }
  0x40   :  { %p268_p0 = pnand %p267_p13, %p261_p10 }
  0x44   :  { %v191_v7 = vpop.eup %190 }
  0x45   :  { %v193_v9 = vpop.eup %192  ;;  %v101_v10 = vadd.f32 1.0, %v191_v7 }
  0x46   :  { %v102_v12 = vadd.f32 1.0, %v193_v9 }
  0x47   :  { %v103_v13 = vmul.f32 0.5, %v101_v10 }
  0x48   :  { %v104_v15 = vmul.f32 0.5, %v102_v12 }
  0x49   :  { %v111_v17 = vsel %vm109_vm0, %v103_v13, 0.0 }
  0x4a   :  { %v112_v18 = vsel %vm110_vm1, %v104_v15, 0.0  ;;  %v116_v19 = vmul.f32 %v113_v14, %v111_v17  ;;  %v128_v20 = vadd.f32 %v113_v14, %v111_v17 }
  0x4b   :  { %v117_v21 = vmul.f32 %v114_v16, %v112_v18  ;;  %v129_v22 = vadd.f32 %v114_v16, %v112_v18 }
  0x4d   :  { %v118_v23 = vadd.f32 %v117_v21, %v116_v19  ;;  %v130_v24 = vadd.f32 %v129_v22, %v128_v20 }
  0x4f   :  { %v119_v25 = vrot.slane %v118_v23, 4  ;;  %v131_v26 = vrot.slane %v130_v24, 4 }
  0x51   :  { %v120_v27 = vadd.f32 %v119_v25, %v118_v23  ;;  %v132_v28 = vadd.f32 %v131_v26, %v130_v24 }
  0x53   :  { %v121_v29 = vrot.slane %v120_v27, 2  ;;  %v133_v30 = vrot.slane %v132_v28, 2 }
  0x55   :  { %v122_v31 = vadd.f32 %v121_v29, %v120_v27  ;;  %v134_v32 = vadd.f32 %v133_v30, %v132_v28 }
  0x57   :  { %v123_v33 = vrot.slane %v122_v31, 1  ;;  %v135_v34 = vrot.slane %v134_v32, 1 }
  0x59   :  { %v124_v37 = vadd.f32 %v123_v33, %v122_v31  ;;  %v136_v38 = vadd.f32 %v135_v34, %v134_v32 }
  0x5b   :  { %v125_v39 = vadd.f32 %v124_v37, %v115_v35  ;;  %v137_v40 = vadd.f32 %v136_v38, %v127_v36 }
  0x5d   :  { %126 = vst [vmem:[#allocation2] sm:$0x1] %v125_v39  ;;  %138 = vst [vmem:[#allocation3] sm:$0x1] %v137_v40 }
  0x64   :  { %v142_v41 = vld [vmem:[#allocation2] sm:$0x1]  ;;  %v144_v42 = vld [vmem:[#allocation3] sm:$0x1] }
  0x65   :  { %143 = vst [vmem:[#allocation10] sm:$0x1] %v142_v41  ;;  %145 = vst [vmem:[#allocation11] sm:$0x1] %v144_v42 }
  0x66   :  { %271 = shalt.err (!%p268_p0)
}
  0x67   :  { %s272_s6 = scalar_lea.hbm %s432_s3, 16 }
  0x68   :  { %p273_p1 = scmp.ne.s32.totalorder %s432_s3, %s272_s6  ;;  %p276_p2 = scmp.lt.u32.totalorder %s272_s6, %s432_s3 }
  0x6a   :  { %p278_p3 = pnand %p276_p2, %p273_p1 }
  0x6c   :  { %281 = shalt.err (!%p278_p3)
}
  0x6d   :  { %155 = dma.vmem_to_hbm [thread:$0]  %s153_s25, 16, %s432_s3, [#allocation6]  }
  0x6e   :  { %s282_s1 = scalar_lea.vmem %s397_s27, 16  ;;  %s286_s13 = scalar_lea.vmem %s397_s27, 32 }
  0x6f   :  { %p283_p4 = scmp.ne.s32.totalorder %s397_s27, %s282_s1  ;;  %p287_p5 = scmp.lt.s32.totalorder %s397_s27, %s397_s27 }
  0x70   :  { %p288_p6 = scmp.lt.s32.totalorder %s286_s13, %s282_s1 }
  0x72   :  { %p289_p7 = por %p288_p6, %p287_p5 }
  0x74   :  { %p290_p8 = pnand %p289_p7, %p283_p4 }
  0x76   :  { %293 = shalt.err (!%p290_p8)
}
  0x77   :  { %s294_s16 = scalar_lea.hbm %s433_s4, 16 }
  0x78   :  { %p295_p9 = scmp.ne.s32.totalorder %s433_s4, %s294_s16  ;;  %p298_p10 = scmp.lt.u32.totalorder %s294_s16, %s433_s4 }
  0x7a   :  { %p300_p11 = pnand %p298_p10, %p295_p9 }
  0x7c   :  { %303 = shalt.err (!%p300_p11)
}
  0x7d   :  { %165 = dma.vmem_to_hbm [thread:$0]  %s397_s27, 16, %s433_s4, [#allocation12]  }
  0x7e   :  { %308 = dma.done.wait [#allocation6], 16  }
  0x7f   :  { %309 = vsyncadd [#allocation6], 4294967280 }
  0x80   :  { %310 = dma.done.wait [#allocation12], 16  }
  0x81   :  { %311 = vsyncadd [#allocation12], 4294967280 }
  0x82   :  { %172 = vsyncpa [#allocation5], 1 }
  0x83   :  { %173 = vsyncpa [#allocation8], 1 }
  0x84   :  { %174 = vsyncpa [#allocation6], 1 }
  0x85   :  { %175 = vsyncpa [#allocation12], 1 }

</bundles_post_ra>
